<compile_context>
chip_gen: v6e
topology: v6e:2x2x1
jax: 0.10.0
libtpu: 0.0.40
codegen_flags: <defaults>
</compile_context>

<pallas_src>
import numpy as np
import jax
import jax.numpy as jnp
from jax import lax
from jax.experimental import pallas as pl
from jax.experimental.pallas import tpu as pltpu

# ---------------- configuration (ProposalNet defaults) ----------------
NC, NH, NS = 10, 12, 10
C_MID = 128                              # conv1/conv2 channels
C_OUT = 5 + 2 * NH + 4 * NS + NC         # = 79 (conv3 channels)
C_OUT_PAD = 128                          # pad to lane width for the kernel
N_PROPOSALS = 128
BATCH = 2
BN_EPS = 1e-5

# column layout of the (padded) conv3 output
OBJ0, OBJ1 = 0, 2
CEN0, CEN1 = 2, 5
HS0, HS1 = 5, 5 + NH                       # heading scores        5:17
HRN0, HRN1 = 5 + NH, 5 + 2 * NH            # heading res. (norm)  17:29
SS0, SS1 = 5 + 2 * NH, 5 + 2 * NH + NS     # size scores          29:39
SRN0, SRN1 = SS1, SS1 + 3 * NS             # size res. (norm)     39:69
SEM0, SEM1 = SRN1, C_OUT                   # sem cls scores       69:79
# fused-decode extras in the spare lanes
HRES0, HRES1 = C_OUT, C_OUT + NH           # heading residuals    79:91
SRES0, SRES1 = HRES1, HRES1 + 3 * NS       # size residuals       91:121

MEAN_SIZES = np.array(
    [[0.76584, 1.398258, 0.472728], [2.114256, 1.6203, 0.927272],
     [0.404671, 1.071108, 1.688889], [0.591958, 0.552978, 0.827272],
     [0.69519, 1.346299, 0.736364], [0.528526, 1.002642, 1.172878],
     [0.500618, 0.632163, 0.683424], [0.923508, 1.867419, 0.845495],
     [0.791118, 1.279516, 0.718182], [0.699104, 0.454178, 0.75625]],
    dtype=np.float32)


# ------- Pallas kernel: conv1+bn1+relu -> conv2+bn2+relu -> conv3 (+decode) -------
def _proposal_head_kernel(x_ref, w_ref, t_ref, xyzp_ref, o_ref):
    B = x_ref.shape[0]
    shifts = t_ref[...]                      # (3, 128): [t1, t2, b3_ext]
    w1 = w_ref[0]                            # (C, C_MID)     BN1 scale folded in
    w2 = w_ref[1]                            # (C_MID, C_MID) BN2 scale folded in
    w3 = w_ref[2]                            # (C_MID, 128)   zero-pad + decode folded in

    # Static unroll over batch (B == 2): no pre-MXU VMEM concat copy; each batch
    # slice goes straight to the MXU and the per-step work stays identical.
    for b in range(B):
        # conv1: contract over the C axis of the (C, N) slice (PyTorch NCW layout
        # consumed directly, no wrapper transpose / extra HBM round trip).
        # TODO(synk): verify via pl.lower_as_mlir that this trans-LHS dot does not
        # emit a standalone vxpose on the target chip (correctness unaffected; a
        # hidden (128,128) transpose per batch is noise in this latency regime).
        h = lax.dot_general(x_ref[b], w1,
                            dimension_numbers=(((0,), (0,)), ((), ())),
                            preferred_element_type=jnp.float32)        # (N, C_MID)
        h = jnp.maximum(h + shifts[0:1, :], 0.0)                       # BN1 shift + ReLU

        # conv2
        h = jnp.dot(h, w2, preferred_element_type=jnp.float32)
        h = jnp.maximum(h + shifts[1:2, :], 0.0)                       # BN2 shift + ReLU

        # conv3 (+ fused decode columns) ; center = xyz + offsets fused via the
        # zero-padded xyz slab (nonzero only in lanes CEN0:CEN1).
        y = jnp.dot(h, w3, preferred_element_type=jnp.float32) + shifts[2:3, :]
        o_ref[b] = y + xyzp_ref[b]                                     # lane-dense (128,128) store


def proposal_head(features_bcn, w_slab, t_slab, xyz_pad):
    """features_bcn: (B, C, N) PyTorch Conv1d layout.  Returns (B, N, C_OUT_PAD)."""
    B, C, N = features_bcn.shape
    full = lambda shape: pl.BlockSpec(shape, lambda i: tuple(0 for _ in shape))

    flops = 2 * (B * N) * C * (C_MID + C_MID + C_OUT_PAD)
    bytes_accessed = 4 * (B * C * N + 3 * C_MID * C_OUT_PAD + 3 * C_OUT_PAD
                          + 2 * B * N * C_OUT_PAD)

    # NOTE: grid=(1,), whole head fits VMEM (<1 MiB << scoped default on
    # v5e/v6e/v7x) -> no vmem_limit / tiling work needed.  Default buffering is
    # left in place (gain from Buffered(1) at grid=(1,) is negligible).
    # TODO(synk): on v7x (2 TCs) a grid=(2,) "parallel" row split could halve
    # per-TC work if this head is latency-critical; needs on-chip measurement.
    return pl.pallas_call(
        _proposal_head_kernel,
        out_shape=jax.ShapeDtypeStruct((B, N, C_OUT_PAD), jnp.float32),
        grid_spec=pltpu.PrefetchScalarGridSpec(
            num_scalar_prefetch=0,
            grid=(1,),
            in_specs=[
                full((B, C, N)),                 # features (NCW)
                full((3, C_MID, C_OUT_PAD)),     # [w1*s1, w2*s2, w3_ext]  (one DMA)
                full((3, C_OUT_PAD)),            # [t1, t2, b3_ext]        (one DMA)
                full((B, N, C_OUT_PAD)),         # xyz zero-padded into lanes 2:5
            ],
            out_specs=full((B, N, C_OUT_PAD)),
        ),
        compiler_params=pltpu.CompilerParams(
            dimension_semantics=("arbitrary",)),
        cost_estimate=pl.CostEstimate(flops=flops, transcendentals=0,
                                      bytes_accessed=bytes_accessed),
    )(features_bcn, w_slab, t_slab, xyz_pad)


# ---------------- decode_scores (pure slicing — all arithmetic fused in-kernel) ----------------
def decode_scores_jax(net_pad, dict_output):
    B, P, _ = net_pad.shape
    dict_output['objectness_scores'] = net_pad[:, :, OBJ0:OBJ1]
    dict_output['center'] = net_pad[:, :, CEN0:CEN1]            # xyz already added in-kernel
    dict_output['heading_scores'] = net_pad[:, :, HS0:HS1]
    dict_output['heading_residuals_normalized'] = net_pad[:, :, HRN0:HRN1]
    dict_output['heading_residuals'] = net_pad[:, :, HRES0:HRES1]        # hrn * pi/NH (in-kernel)
    dict_output['size_scores'] = net_pad[:, :, SS0:SS1]
    dict_output['size_residuals_normalized'] = net_pad[:, :, SRN0:SRN1].reshape(B, P, NS, 3)
    dict_output['size_residuals'] = net_pad[:, :, SRES0:SRES1].reshape(B, P, NS, 3)
    dict_output['sem_cls_scores'] = net_pad[:, :, SEM0:SEM1]
    return dict_output


# ---------------- parameter setup / BN folding (glue) ----------------
def make_params(key):
    ks = jax.random.split(key, 16)
    p = {}
    # Conv1d(kernel=1) weights stored as (Cin, Cout) for right-multiply.
    p['w1'] = jax.random.normal(ks[0], (C_MID, C_MID), jnp.float32) * 0.05
    p['b1'] = jax.random.normal(ks[1], (C_MID,), jnp.float32) * 0.05
    p['w2'] = jax.random.normal(ks[2], (C_MID, C_MID), jnp.float32) * 0.05
    p['b2'] = jax.random.normal(ks[3], (C_MID,), jnp.float32) * 0.05
    p['w3'] = jax.random.normal(ks[4], (C_MID, C_OUT), jnp.float32) * 0.05
    p['b3'] = jax.random.normal(ks[5], (C_OUT,), jnp.float32) * 0.05
    # BatchNorm1d params + running stats (eval mode).
    for i, base in enumerate((6, 10), start=1):
        p[f'gamma{i}'] = jax.random.uniform(ks[base + 0], (C_MID,), jnp.float32, 0.8, 1.2)
        p[f'beta{i}'] = jax.random.normal(ks[base + 1], (C_MID,), jnp.float32) * 0.05
        p[f'mean{i}'] = jax.random.normal(ks[base + 2], (C_MID,), jnp.float32) * 0.05
        p[f'var{i}'] = jax.random.uniform(ks[base + 3], (C_MID,), jnp.float32, 0.5, 1.5)
    return p


def fold_bn(gamma, beta, mean, var, conv_bias):
    scale = gamma / jnp.sqrt(var + BN_EPS)
    shift = scale * (conv_bias - mean) + beta
    return scale, shift                      # shift kept as (C,) for slab stacking


def proposal_net_forward(xyz, features_bcn, fps_inds, params):
    """xyz: (B, P, 3); features_bcn: (B, C, P) [PyTorch Conv1d layout]."""
    dict_output = {'aggregated_vote_xyz': xyz, 'aggregated_vote_inds': fps_inds}

    s1, t1 = fold_bn(params['gamma1'], params['beta1'],
                     params['mean1'], params['var1'], params['b1'])
    s2, t2 = fold_bn(params['gamma2'], params['beta2'],
                     params['mean2'], params['var2'], params['b2'])
    w1s = params['w1'] * s1[None, :]
    w2s = params['w2'] * s2[None, :]

    # conv3 weight/bias: zero-pad to 128 lanes and fold the decode elementwise
    # ops into extra columns (heading_residuals, size_residuals) — zero extra
    # in-kernel work, the MXU computes them as part of the same matmul.
    mean_flat = jnp.asarray(MEAN_SIZES.reshape(-1))          # (30,)
    w3, b3 = params['w3'], params['b3']
    w3e = jnp.zeros((C_MID, C_OUT_PAD), jnp.float32).at[:, :C_OUT].set(w3)
    w3e = w3e.at[:, HRES0:HRES1].set(w3[:, HRN0:HRN1] * (np.pi / NH))
    w3e = w3e.at[:, SRES0:SRES1].set(w3[:, SRN0:SRN1] * mean_flat[None, :])
    b3e = jnp.zeros((C_OUT_PAD,), jnp.float32).at[:C_OUT].set(b3)
    b3e = b3e.at[HRES0:HRES1].set(b3[HRN0:HRN1] * (np.pi / NH))
    b3e = b3e.at[SRES0:SRES1].set(b3[SRN0:SRN1] * mean_flat)

    # Pack operands into two slabs -> fewer serial DMA descriptors at grid=(1,).
    w_slab = jnp.stack([w1s, w2s, w3e], axis=0)              # (3, 128, 128)
    t_slab = jnp.stack([t1, t2, b3e], axis=0)                # (3, 128)

    # center = aggregated_vote_xyz + offsets fused in-kernel: xyz zero-padded
    # into lanes CEN0:CEN1 of a lane-dense (B, N, 128) slab.
    B, N = xyz.shape[0], xyz.shape[1]
    xyz_pad = jnp.zeros((B, N, C_OUT_PAD), jnp.float32).at[:, :, CEN0:CEN1].set(xyz)

    net_pad = proposal_head(features_bcn, w_slab, t_slab, xyz_pad)
    return decode_scores_jax(net_pad, dict_output)


# ---------------- pure-JAX reference for sanity check ----------------
def _reference_net_t(features_bcn, params):
    x = jnp.transpose(features_bcn, (0, 2, 1))
    s1, t1 = fold_bn(params['gamma1'], params['beta1'],
                     params['mean1'], params['var1'], params['b1'])
    s2, t2 = fold_bn(params['gamma2'], params['beta2'],
                     params['mean2'], params['var2'], params['b2'])
    h = jnp.maximum(x @ params['w1'] * s1[None, None, :] + t1[None, None, :], 0.0)
    h = jnp.maximum(h @ params['w2'] * s2[None, None, :] + t2[None, None, :], 0.0)
    return h @ params['w3'] + params['b3']


if __name__ == "__main__":
    key = jax.random.PRNGKey(0)
    k_xyz, k_feat, k_inds, k_par = jax.random.split(key, 4)

    # Inputs = outputs of the (external) PointnetSAModuleVotes layer.
    xyz = jax.random.normal(k_xyz, (BATCH, N_PROPOSALS, 3), jnp.float32)
    features = jax.random.normal(k_feat, (BATCH, C_MID, N_PROPOSALS), jnp.float32)
    fps_inds = jax.random.randint(k_inds, (BATCH, N_PROPOSALS), 0, 1024, jnp.int32)
    params = make_params(k_par)

    fwd = jax.jit(proposal_net_forward)
    out = fwd(xyz, features, fps_inds, params)
    jax.tree_util.tree_map(jax.block_until_ready, out)

    # sanity check kernel (incl. fused decode) vs pure-JAX reference
    ref = np.asarray(_reference_net_t(features, params))          # (B, P, 79)
    xyz_np = np.asarray(xyz)
    tol = dict(rtol=2e-4, atol=2e-4)
    np.testing.assert_allclose(np.asarray(out['objectness_scores']), ref[:, :, OBJ0:OBJ1], **tol)
    np.testing.assert_allclose(np.asarray(out['center']), xyz_np + ref[:, :, CEN0:CEN1], **tol)
    np.testing.assert_allclose(np.asarray(out['heading_scores']), ref[:, :, HS0:HS1], **tol)
    np.testing.assert_allclose(np.asarray(out['heading_residuals_normalized']),
                               ref[:, :, HRN0:HRN1], **tol)
    np.testing.assert_allclose(np.asarray(out['heading_residuals']),
                               ref[:, :, HRN0:HRN1] * (np.pi / NH), **tol)
    np.testing.assert_allclose(np.asarray(out['size_scores']), ref[:, :, SS0:SS1], **tol)
    srn_ref = ref[:, :, SRN0:SRN1].reshape(BATCH, N_PROPOSALS, NS, 3)
    np.testing.assert_allclose(np.asarray(out['size_residuals_normalized']), srn_ref, **tol)
    np.testing.assert_allclose(np.asarray(out['size_residuals']),
                               srn_ref * MEAN_SIZES[None, None], **tol)
    np.testing.assert_allclose(np.asarray(out['sem_cls_scores']), ref[:, :, SEM0:SEM1], **tol)

    assert out['center'].shape == (BATCH, N_PROPOSALS, 3)
    assert out['size_residuals'].shape == (BATCH, N_PROPOSALS, NS, 3)
    assert out['sem_cls_scores'].shape == (BATCH, N_PROPOSALS, NC)
    print("KERNEL_OK")
</pallas_src>

<mosaic_0001>
module attributes {stable_mosaic.version = 11 : i64} {
  func.func @_proposal_head_kernel(%arg0: i32, %arg1: memref<2x128x128xf32, #tpu.memory_space<vmem>>, %arg2: memref<3x128x128xf32, #tpu.memory_space<vmem>>, %arg3: memref<3x128xf32, #tpu.memory_space<vmem>>, %arg4: memref<2x128x128xf32, #tpu.memory_space<vmem>>, %arg5: memref<2x128x128xf32, #tpu.memory_space<vmem>>) attributes {dimension_semantics = [#tpu.dimension_semantics<arbitrary>], iteration_bounds = array<i64: 1>, scalar_prefetch = 0 : i64, scratch_operands = 0 : i64, tpu.core_type = #tpu.core_type<tc>, window_params = [{pipeline_mode = #tpu.pipeline_mode<synchronous>, transform_indices = @transform_0, window_bounds = array<i64: 2, 128, 128>}, {pipeline_mode = #tpu.pipeline_mode<synchronous>, transform_indices = @transform_1, window_bounds = array<i64: 3, 128, 128>}, {pipeline_mode = #tpu.pipeline_mode<synchronous>, transform_indices = @transform_2, window_bounds = array<i64: 3, 128>}, {pipeline_mode = #tpu.pipeline_mode<synchronous>, transform_indices = @transform_3, window_bounds = array<i64: 2, 128, 128>}, {pipeline_mode = #tpu.pipeline_mode<synchronous>, transform_indices = @transform_4, window_bounds = array<i64: 2, 128, 128>}]} {
    %c0 = arith.constant 0 : index
    %c0_0 = arith.constant 0 : index
    %0 = vector.load %arg3[%c0, %c0_0] : memref<3x128xf32, #tpu.memory_space<vmem>>, vector<3x128xf32>
    %c0_1 = arith.constant 0 : index
    %c0_2 = arith.constant 0 : index
    %c0_3 = arith.constant 0 : index
    %1 = vector.load %arg2[%c0_1, %c0_2, %c0_3] : memref<3x128x128xf32, #tpu.memory_space<vmem>>, vector<1x128x128xf32>
    %2 = vector.shape_cast %1 : vector<1x128x128xf32> to vector<128x128xf32>
    %c1 = arith.constant 1 : index
    %c0_4 = arith.constant 0 : index
    %c0_5 = arith.constant 0 : index
    %3 = vector.load %arg2[%c1, %c0_4, %c0_5] : memref<3x128x128xf32, #tpu.memory_space<vmem>>, vector<1x128x128xf32>
    %4 = vector.shape_cast %3 : vector<1x128x128xf32> to vector<128x128xf32>
    %c2 = arith.constant 2 : index
    %c0_6 = arith.constant 0 : index
    %c0_7 = arith.constant 0 : index
    %5 = vector.load %arg2[%c2, %c0_6, %c0_7] : memref<3x128x128xf32, #tpu.memory_space<vmem>>, vector<1x128x128xf32>
    %6 = vector.shape_cast %5 : vector<1x128x128xf32> to vector<128x128xf32>
    %c0_8 = arith.constant 0 : index
    %c0_9 = arith.constant 0 : index
    %c0_10 = arith.constant 0 : index
    %7 = vector.load %arg1[%c0_8, %c0_9, %c0_10] : memref<2x128x128xf32, #tpu.memory_space<vmem>>, vector<1x128x128xf32>
    %8 = vector.shape_cast %7 : vector<1x128x128xf32> to vector<128x128xf32>
    %cst = arith.constant dense<0.000000e+00> : vector<128x128xf32>
    %9 = tpu.matmul %8, %2, %cst {dimension_numbers = #tpu.dot_dimension_numbers<[0], [0], [1], [1], [0, 1, 1, 1], [], []>} : vector<128x128xf32>, vector<128x128xf32>, vector<128x128xf32> -> vector<128x128xf32>
    %10 = vector.extract_strided_slice %0 {offsets = [0, 0], sizes = [1, 128], strides = [1, 1]} : vector<3x128xf32> to vector<1x128xf32>
    %11 = vector.broadcast %10 : vector<1x128xf32> to vector<128x128xf32>
    %12 = arith.addf %9, %11 : vector<128x128xf32>
    %cst_11 = arith.constant 0.000000e+00 : f32
    %13 = vector.broadcast %cst_11 : f32 to vector<128x128xf32>
    %14 = arith.maximumf %12, %13 : vector<128x128xf32>
    %cst_12 = arith.constant dense<0.000000e+00> : vector<128x128xf32>
    %15 = tpu.matmul %14, %4, %cst_12 {dimension_numbers = #tpu.dot_dimension_numbers<[1], [0], [0], [1], [0, 0, 1, 1], [], []>} : vector<128x128xf32>, vector<128x128xf32>, vector<128x128xf32> -> vector<128x128xf32>
    %16 = vector.extract_strided_slice %0 {offsets = [1, 0], sizes = [1, 128], strides = [1, 1]} : vector<3x128xf32> to vector<1x128xf32>
    %17 = vector.broadcast %16 : vector<1x128xf32> to vector<128x128xf32>
    %18 = arith.addf %15, %17 : vector<128x128xf32>
    %cst_13 = arith.constant 0.000000e+00 : f32
    %19 = vector.broadcast %cst_13 : f32 to vector<128x128xf32>
    %20 = arith.maximumf %18, %19 : vector<128x128xf32>
    %cst_14 = arith.constant dense<0.000000e+00> : vector<128x128xf32>
    %21 = tpu.matmul %20, %6, %cst_14 {dimension_numbers = #tpu.dot_dimension_numbers<[1], [0], [0], [1], [0, 0, 1, 1], [], []>} : vector<128x128xf32>, vector<128x128xf32>, vector<128x128xf32> -> vector<128x128xf32>
    %22 = vector.extract_strided_slice %0 {offsets = [2, 0], sizes = [1, 128], strides = [1, 1]} : vector<3x128xf32> to vector<1x128xf32>
    %23 = vector.broadcast %22 : vector<1x128xf32> to vector<128x128xf32>
    %24 = arith.addf %21, %23 : vector<128x128xf32>
    %c0_15 = arith.constant 0 : index
    %c0_16 = arith.constant 0 : index
    %c0_17 = arith.constant 0 : index
    %25 = vector.load %arg4[%c0_15, %c0_16, %c0_17] : memref<2x128x128xf32, #tpu.memory_space<vmem>>, vector<1x128x128xf32>
    %26 = vector.shape_cast %25 : vector<1x128x128xf32> to vector<128x128xf32>
    %27 = arith.addf %24, %26 : vector<128x128xf32>
    %c0_18 = arith.constant 0 : index
    %c0_19 = arith.constant 0 : index
    %c0_20 = arith.constant 0 : index
    %28 = vector.load %arg5[%c0_18, %c0_19, %c0_20] : memref<2x128x128xf32, #tpu.memory_space<vmem>>, vector<1x128x128xf32>
    %29 = vector.shape_cast %28 : vector<1x128x128xf32> to vector<128x128xf32>
    %30 = vector.shape_cast %27 : vector<128x128xf32> to vector<1x128x128xf32>
    tpu.vector_store %arg5[%c0_18, %c0_19, %c0_20], %30 {strides = array<i32>} : memref<2x128x128xf32, #tpu.memory_space<vmem>>, vector<1x128x128xf32>,
    %c1_21 = arith.constant 1 : index
    %c0_22 = arith.constant 0 : index
    %c0_23 = arith.constant 0 : index
    %31 = vector.load %arg1[%c1_21, %c0_22, %c0_23] : memref<2x128x128xf32, #tpu.memory_space<vmem>>, vector<1x128x128xf32>
    %32 = vector.shape_cast %31 : vector<1x128x128xf32> to vector<128x128xf32>
    %cst_24 = arith.constant dense<0.000000e+00> : vector<128x128xf32>
    %33 = tpu.matmul %32, %2, %cst_24 {dimension_numbers = #tpu.dot_dimension_numbers<[0], [0], [1], [1], [0, 1, 1, 1], [], []>} : vector<128x128xf32>, vector<128x128xf32>, vector<128x128xf32> -> vector<128x128xf32>
    %34 = vector.extract_strided_slice %0 {offsets = [0, 0], sizes = [1, 128], strides = [1, 1]} : vector<3x128xf32> to vector<1x128xf32>
    %35 = vector.broadcast %34 : vector<1x128xf32> to vector<128x128xf32>
    %36 = arith.addf %33, %35 : vector<128x128xf32>
    %cst_25 = arith.constant 0.000000e+00 : f32
    %37 = vector.broadcast %cst_25 : f32 to vector<128x128xf32>
    %38 = arith.maximumf %36, %37 : vector<128x128xf32>
    %cst_26 = arith.constant dense<0.000000e+00> : vector<128x128xf32>
    %39 = tpu.matmul %38, %4, %cst_26 {dimension_numbers = #tpu.dot_dimension_numbers<[1], [0], [0], [1], [0, 0, 1, 1], [], []>} : vector<128x128xf32>, vector<128x128xf32>, vector<128x128xf32> -> vector<128x128xf32>
    %40 = vector.extract_strided_slice %0 {offsets = [1, 0], sizes = [1, 128], strides = [1, 1]} : vector<3x128xf32> to vector<1x128xf32>
    %41 = vector.broadcast %40 : vector<1x128xf32> to vector<128x128xf32>
    %42 = arith.addf %39, %41 : vector<128x128xf32>
    %cst_27 = arith.constant 0.000000e+00 : f32
    %43 = vector.broadcast %cst_27 : f32 to vector<128x128xf32>
    %44 = arith.maximumf %42, %43 : vector<128x128xf32>
    %cst_28 = arith.constant dense<0.000000e+00> : vector<128x128xf32>
    %45 = tpu.matmul %44, %6, %cst_28 {dimension_numbers = #tpu.dot_dimension_numbers<[1], [0], [0], [1], [0, 0, 1, 1], [], []>} : vector<128x128xf32>, vector<128x128xf32>, vector<128x128xf32> -> vector<128x128xf32>
    %46 = vector.extract_strided_slice %0 {offsets = [2, 0], sizes = [1, 128], strides = [1, 1]} : vector<3x128xf32> to vector<1x128xf32>
    %47 = vector.broadcast %46 : vector<1x128xf32> to vector<128x128xf32>
    %48 = arith.addf %45, %47 : vector<128x128xf32>
    %c1_29 = arith.constant 1 : index
    %c0_30 = arith.constant 0 : index
    %c0_31 = arith.constant 0 : index
    %49 = vector.load %arg4[%c1_29, %c0_30, %c0_31] : memref<2x128x128xf32, #tpu.memory_space<vmem>>, vector<1x128x128xf32>
    %50 = vector.shape_cast %49 : vector<1x128x128xf32> to vector<128x128xf32>
    %51 = arith.addf %48, %50 : vector<128x128xf32>
    %c1_32 = arith.constant 1 : index
    %c0_33 = arith.constant 0 : index
    %c0_34 = arith.constant 0 : index
    %52 = vector.load %arg5[%c1_32, %c0_33, %c0_34] : memref<2x128x128xf32, #tpu.memory_space<vmem>>, vector<1x128x128xf32>
    %53 = vector.shape_cast %52 : vector<1x128x128xf32> to vector<128x128xf32>
    %54 = vector.shape_cast %51 : vector<128x128xf32> to vector<1x128x128xf32>
    tpu.vector_store %arg5[%c1_32, %c0_33, %c0_34], %54 {strides = array<i32>} : memref<2x128x128xf32, #tpu.memory_space<vmem>>, vector<1x128x128xf32>,
    return
  }
  func.func @transform_0(%arg0: i32) -> (i32, i32, i32) {
    %c0_i32 = arith.constant 0 : i32
    %c0_i32_0 = arith.constant 0 : i32
    %c0_i32_1 = arith.constant 0 : i32
    %c0_i32_2 = arith.constant 0 : i32
    return %c0_i32, %c0_i32_0, %c0_i32_1 : i32, i32, i32
  }
  func.func @transform_1(%arg0: i32) -> (i32, i32, i32) {
    %c0_i32 = arith.constant 0 : i32
    %c0_i32_0 = arith.constant 0 : i32
    %c0_i32_1 = arith.constant 0 : i32
    %c0_i32_2 = arith.constant 0 : i32
    return %c0_i32, %c0_i32_0, %c0_i32_1 : i32, i32, i32
  }
  func.func @transform_2(%arg0: i32) -> (i32, i32) {
    %c0_i32 = arith.constant 0 : i32
    %c0_i32_0 = arith.constant 0 : i32
    %c0_i32_1 = arith.constant 0 : i32
    return %c0_i32, %c0_i32_0 : i32, i32
  }
  func.func @transform_3(%arg0: i32) -> (i32, i32, i32) {
    %c0_i32 = arith.constant 0 : i32
    %c0_i32_0 = arith.constant 0 : i32
    %c0_i32_1 = arith.constant 0 : i32
    %c0_i32_2 = arith.constant 0 : i32
    return %c0_i32, %c0_i32_0, %c0_i32_1 : i32, i32, i32
  }
  func.func @transform_4(%arg0: i32) -> (i32, i32, i32) {
    %c0_i32 = arith.constant 0 : i32
    %c0_i32_0 = arith.constant 0 : i32
    %c0_i32_1 = arith.constant 0 : i32
    %c0_i32_2 = arith.constant 0 : i32
    return %c0_i32, %c0_i32_0, %c0_i32_1 : i32, i32, i32
  }
}

</mosaic_0001>

<bundles_post_ra>
// kernel: proposal_net_forward.1
= control target key start
LH: loop header
LB: loop body
LE: loop exit
PB: predicated region body
PF: predicated region fallthrough
CT: control target
= control target key end

     0   :  { %s2675_s0 = inlined_call_operand.vmem [shape: f32[2,128,128], index: 0, kind: input, shape index: {}]   ;;  %s2676_s1 = inlined_call_operand.vmem [shape: f32[3,128,128], index: 1, kind: input, shape index: {}]   ;;  %s2677_s2 = inlined_call_operand.vmem [shape: f32[3,128], index: 2, kind: input, shape index: {}]   ;;  %s2678_s3 = inlined_call_operand.vmem [shape: f32[2,128,128], index: 3, kind: input, shape index: {}]   ;;  %s2679_s4 = inlined_call_operand.vmem [shape: f32[2,128,128], index: 4, kind: output, shape index: {}]  }
   0x1   :  { %v68_v0 = vld [vmem:[%s2675_s0] sm:$0xff]  ;;  %v69_v1 = vld [vmem:[%s2675_s0 + $0x8] sm:$0xff]  ;;  %v1855_v2 = vld [vmem:[%s2676_s1 + $0x78] sm:$0xff] }
   0x2   :  { %88 = vxpose.xlu0.b32.start [1/16] %v68_v0, 128  ;;  %v1860_v3 = vld [vmem:[%s2676_s1 + $0x70] sm:$0xff]  ;;  %1485 = vmatprep.subr.mxu0 %v1855_v2  ;;  %v1870_v5 = vld [vmem:[%s2676_s1 + $0x68] sm:$0xff]  ;;  %v1877_v6 = vld [vmem:[%s2676_s1 + $0x60] sm:$0xff] }
   0x3   :  { %v70_v4 = vld [vmem:[%s2675_s0 + $0x10] sm:$0xff]  ;;  %1486 = vmatpush3.msra.mxu0 %v1855_v2  ;;  %v71_v7 = vld [vmem:[%s2675_s0 + $0x18] sm:$0xff]  ;;  %v72_v10 = vld [vmem:[%s2675_s0 + $0x20] sm:$0xff] }
   0x4   :  { %1487 = vmatprep.subr.mxu0 %v1860_v3  ;;  %v1887_v8 = vld [vmem:[%s2676_s1 + $0x58] sm:$0xff]  ;;  %v1894_v9 = vld [vmem:[%s2676_s1 + $0x50] sm:$0xff]  ;;  %v1904_v11 = vld [vmem:[%s2676_s1 + $0x48] sm:$0xff] }
   0x5   :  { %1488 = vmatpush3.msra.mxu0 %v1860_v3  ;;  %v1911_v12 = vld [vmem:[%s2676_s1 + $0x40] sm:$0xff]  ;;  %v73_v13 = vld [vmem:[%s2675_s0 + $0x28] sm:$0xff]  ;;  %v1921_v14 = vld [vmem:[%s2676_s1 + $0x38] sm:$0xff] }
   0x6   :  { %89 = vxpose.xlu0.b32.cont [2/16] %v69_v1, 128  ;;  %1489 = vmatprep.subr.mxu0 %v1870_v5  ;;  %v1928_v15 = vld [vmem:[%s2676_s1 + $0x30] sm:$0xff]  ;;  %v1938_v17 = vld [vmem:[%s2676_s1 + $0x28] sm:$0xff]  ;;  %v1945_v18 = vld [vmem:[%s2676_s1 + $0x20] sm:$0xff] }
   0x7   :  { %1490 = vmatpush3.msra.mxu0 %v1870_v5  ;;  %v74_v16 = vld [vmem:[%s2675_s0 + $0x30] sm:$0xff]  ;;  %v75_v19 = vld [vmem:[%s2675_s0 + $0x38] sm:$0xff]  ;;  %v76_v22 = vld [vmem:[%s2675_s0 + $0x40] sm:$0xff] }
   0x8   :  { %1491 = vmatprep.subr.mxu0 %v1877_v6  ;;  %v1955_v20 = vld [vmem:[%s2676_s1 + $0x18] sm:$0xff]  ;;  %v1962_v21 = vld [vmem:[%s2676_s1 + $0x10] sm:$0xff]  ;;  %v1972_v23 = vld [vmem:[%s2676_s1 + $0x8] sm:$0xff] }
   0x9   :  { %1492 = vmatpush3.msra.mxu0 %v1877_v6  ;;  %v1979_v24 = vld [vmem:[%s2676_s1] sm:$0xff]  ;;  %v77_v25 = vld [vmem:[%s2675_s0 + $0x48] sm:$0xff]  ;;  %v78_v26 = vld [vmem:[%s2675_s0 + $0x50] sm:$0xff] }
   0xa   :  { %90 = vxpose.xlu0.b32.cont [3/16] %v70_v4, 128  ;;  %1493 = vmatprep.subr.mxu0 %v1887_v8  ;;  %v79_v27 = vld [vmem:[%s2675_s0 + $0x58] sm:$0xff]  ;;  %v80_v28 = vld [vmem:[%s2675_s0 + $0x60] sm:$0xff]  ;;  %v81_v29 = vld [vmem:[%s2675_s0 + $0x68] sm:$0xff] }
   0xb   :  { %1494 = vmatpush3.msra.mxu0 %v1887_v8  ;;  %v82_v30 = vld [vmem:[%s2675_s0 + $0x70] sm:$0xff]  ;;  %v83_v31 = vld [vmem:[%s2675_s0 + $0x78] sm:$0xff]  ;;  %v1245_v32 = vld [vmem:[%s2675_s0 + $0x80] sm:$0xff] }
   0xc   :  { %1495 = vmatprep.subr.mxu0 %v1894_v9  ;;  %660 = vxpose.xlu1.b32.start [1/16] %v1245_v32, 128  ;;  %v1246_v33 = vld [vmem:[%s2675_s0 + $0x88] sm:$0xff]  ;;  %v2015_v34 = vld [vmem:[%s2676_s1 + $0xf8] sm:$0xff]  ;;  %v2020_v35 = vld [vmem:[%s2676_s1 + $0xf0] sm:$0xff] }
   0xd   :  { %1496 = vmatpush3.msra.mxu0 %v1894_v9  ;;  %v1247_v36 = vld [vmem:[%s2675_s0 + $0x90] sm:$0xff]  ;;  %1541 = vmatprep.subr.mxu1 %v2015_v34  ;;  %v2030_v37 = vld [vmem:[%s2676_s1 + $0xe8] sm:$0xff]  ;;  %v2037_v38 = vld [vmem:[%s2676_s1 + $0xe0] sm:$0xff] }
   0xe   :  { %91 = vxpose.xlu0.b32.cont [4/16] %v71_v7, 128  ;;  %1497 = vmatprep.subr.mxu0 %v1904_v11  ;;  %v1248_v39 = vld [vmem:[%s2675_s0 + $0x98] sm:$0xff]  ;;  %v2054_v41 = vld [vmem:[%s2676_s1 + $0xd0] sm:$0xff]  ;;  %v1249_v42 = vld [vmem:[%s2675_s0 + $0xa0] sm:$0xff] }
   0xf   :  { %1498 = vmatpush3.msra.mxu0 %v1904_v11  ;;  %1542 = vmatpush3.msra.mxu1 %v2015_v34  ;;  %v2047_v40 = vld [vmem:[%s2676_s1 + $0xd8] sm:$0xff]  ;;  %v2064_v43 = vld [vmem:[%s2676_s1 + $0xc8] sm:$0xff]  ;;  %v2071_v44 = vld [vmem:[%s2676_s1 + $0xc0] sm:$0xff] }
  0x10   :  { %1499 = vmatprep.subr.mxu0 %v1911_v12  ;;  %661 = vxpose.xlu1.b32.cont [2/16] %v1246_v33, 128  ;;  %v1250_v45 = vld [vmem:[%s2675_s0 + $0xa8] sm:$0xff]  ;;  %v2081_v46 = vld [vmem:[%s2676_s1 + $0xb8] sm:$0xff]  ;;  %v2088_v47 = vld [vmem:[%s2676_s1 + $0xb0] sm:$0xff] }
  0x11   :  { %1500 = vmatpush3.msra.mxu0 %v1911_v12  ;;  %1543 = vmatprep.subr.mxu1 %v2020_v35  ;;  %v1251_v48 = vld [vmem:[%s2675_s0 + $0xb0] sm:$0xff]  ;;  %v2098_v49 = vld [vmem:[%s2676_s1 + $0xa8] sm:$0xff]  ;;  %v2105_v50 = vld [vmem:[%s2676_s1 + $0xa0] sm:$0xff] }
  0x12   :  { %92 = vxpose.xlu0.b32.cont [5/16] %v72_v10, 128  ;;  %1501 = vmatprep.subr.mxu0 %v1921_v14  ;;  %v1252_v51 = vld [vmem:[%s2675_s0 + $0xb8] sm:$0xff]  ;;  %v1253_v52 = vld [vmem:[%s2675_s0 + $0xc0] sm:$0xff]  ;;  %v1254_v53 = vld [vmem:[%s2675_s0 + $0xc8] sm:$0xff] }
  0x13   :  { %1502 = vmatpush3.msra.mxu0 %v1921_v14  ;;  %1544 = vmatpush3.msra.mxu1 %v2020_v35  ;;  %v1255_v54 = vld [vmem:[%s2675_s0 + $0xd0] sm:$0xff]  ;;  %v1256_v55 = vld [vmem:[%s2675_s0 + $0xd8] sm:$0xff]  ;;  %v1257_v56 = vld [vmem:[%s2675_s0 + $0xe0] sm:$0xff] }
  0x14   :  { %1503 = vmatprep.subr.mxu0 %v1928_v15  ;;  %662 = vxpose.xlu1.b32.cont [3/16] %v1247_v36, 128  ;;  %v1258_v57 = vld [vmem:[%s2675_s0 + $0xe8] sm:$0xff]  ;;  %v1259_v58 = vld [vmem:[%s2675_s0 + $0xf0] sm:$0xff]  ;;  %v1260_v59 = vld [vmem:[%s2675_s0 + $0xf8] sm:$0xff] }
  0x15   :  { %1504 = vmatpush3.msra.mxu0 %v1928_v15  ;;  %1545 = vmatprep.subr.mxu1 %v2030_v37  ;;  %v2170_v32 = vld [vmem:[%s2676_s1 + $0x178] sm:$0xff]  ;;  %v2175_v33 = vld [vmem:[%s2676_s1 + $0x170] sm:$0xff]  ;;  %v2182_v36 = vld [vmem:[%s2676_s1 + $0x168] sm:$0xff] }
  0x16   :  { %93 = vxpose.xlu0.b32.cont [6/16] %v73_v13, 128  ;;  %1505 = vmatprep.subr.mxu0 %v1938_v17 }
  0x17   :  { %1506 = vmatpush3.msra.mxu0 %v1938_v17  ;;  %1546 = vmatpush3.msra.mxu1 %v2030_v37 }
  0x18   :  { %1507 = vmatprep.subr.mxu0 %v1945_v18  ;;  %1547 = vmatprep.subr.mxu1 %v2037_v38 }
  0x19   :  { %1508 = vmatpush3.msra.mxu0 %v1945_v18  ;;  %663 = vxpose.xlu1.b32.cont [4/16] %v1248_v39, 128  ;;  %v2189_v39 = vld [vmem:[%s2676_s1 + $0x160] sm:$0xff] }
  0x1a   :  { %94 = vxpose.xlu0.b32.cont [7/16] %v74_v16, 128  ;;  %1509 = vmatprep.subr.mxu0 %v1955_v20 }
  0x1b   :  { %1510 = vmatpush3.msra.mxu0 %v1955_v20  ;;  %1548 = vmatpush3.msra.mxu1 %v2037_v38 }
  0x1c   :  { %1511 = vmatprep.subr.mxu0 %v1962_v21  ;;  %1549 = vmatprep.subr.mxu1 %v2047_v40 }
  0x1d   :  { %1512 = vmatpush3.msra.mxu0 %v1962_v21  ;;  %1550 = vmatpush3.msra.mxu1 %v2047_v40 }
  0x1e   :  { %95 = vxpose.xlu0.b32.cont [8/16] %v75_v19, 128  ;;  %1513 = vmatprep.subr.mxu0 %v1972_v23 }
  0x1f   :  { %1514 = vmatpush3.msra.mxu0 %v1972_v23  ;;  %1551 = vmatprep.subr.mxu1 %v2054_v41 }
  0x20   :  { %1515 = vmatprep.subr.mxu0 %v1979_v24  ;;  %664 = vxpose.xlu1.b32.cont [5/16] %v1249_v42, 128  ;;  %v2196_v42 = vld [vmem:[%s2676_s1 + $0x158] sm:$0xff] }
  0x21   :  { %1516 = vmatpush3.msra.mxu0 %v1979_v24  ;;  %1552 = vmatpush3.msra.mxu1 %v2054_v41 }
  0x22   :  { %96 = vxpose.xlu0.b32.cont [9/16] %v76_v22, 128  ;;  %1553 = vmatprep.subr.mxu1 %v2064_v43 }
  0x23   :  { %1554 = vmatpush3.msra.mxu1 %v2064_v43  ;;  %1597 = vmatprep.subr.mxu0 %v2170_v32 }
  0x24   :  { %1555 = vmatprep.subr.mxu1 %v2071_v44  ;;  %665 = vxpose.xlu1.b32.cont [6/16] %v1250_v45, 128  ;;  %v2203_v45 = vld [vmem:[%s2676_s1 + $0x150] sm:$0xff] }
  0x25   :  { %1556 = vmatpush3.msra.mxu1 %v2071_v44 }
  0x26   :  { %97 = vxpose.xlu0.b32.cont [10/16] %v77_v25, 128  ;;  %1557 = vmatprep.subr.mxu1 %v2081_v46 }
  0x27   :  { %1558 = vmatpush3.msra.mxu1 %v2081_v46 }
  0x28   :  { %1559 = vmatprep.subr.mxu1 %v2088_v47  ;;  %666 = vxpose.xlu1.b32.cont [7/16] %v1251_v48, 128  ;;  %v2210_v48 = vld [vmem:[%s2676_s1 + $0x148] sm:$0xff] }
  0x29   :  { %1560 = vmatpush3.msra.mxu1 %v2088_v47 }
  0x2a   :  { %98 = vxpose.xlu0.b32.cont [11/16] %v78_v26, 128  ;;  %1561 = vmatprep.subr.mxu1 %v2098_v49 }
  0x2b   :  { %1562 = vmatpush3.msra.mxu1 %v2098_v49 }
  0x2c   :  { %1563 = vmatprep.subr.mxu1 %v2105_v50  ;;  %667 = vxpose.xlu1.b32.cont [8/16] %v1252_v51, 128  ;;  %v2217_v51 = vld [vmem:[%s2676_s1 + $0x140] sm:$0xff] }
  0x2d   :  { %1564 = vmatpush3.msra.mxu1 %v2105_v50 }
  0x2e   :  { %99 = vxpose.xlu0.b32.cont [12/16] %v79_v27, 128 }
  0x30   :  { %668 = vxpose.xlu1.b32.cont [9/16] %v1253_v52, 128  ;;  %v2224_v52 = vld [vmem:[%s2676_s1 + $0x138] sm:$0xff] }
  0x32   :  { %100 = vxpose.xlu0.b32.cont [13/16] %v80_v28, 128  ;;  %v2141_v28 = vld [vmem:[%s2676_s1 + $0x98] sm:$0xff] }
  0x33   :  { %1565 = vmatprep.subr.mxu1 %v2141_v28 }
  0x34   :  { %669 = vxpose.xlu1.b32.cont [10/16] %v1254_v53, 128  ;;  %1566 = vmatpush3.msra.mxu1 %v2141_v28  ;;  %v2231_v53 = vld [vmem:[%s2676_s1 + $0x130] sm:$0xff] }
  0x36   :  { %101 = vxpose.xlu0.b32.cont [14/16] %v81_v29, 128  ;;  %v2148_v29 = vld [vmem:[%s2676_s1 + $0x90] sm:$0xff] }
  0x37   :  { %1567 = vmatprep.subr.mxu1 %v2148_v29 }
  0x38   :  { %670 = vxpose.xlu1.b32.cont [11/16] %v1255_v54, 128  ;;  %1568 = vmatpush3.msra.mxu1 %v2148_v29  ;;  %v84_v54 = vlaneseq }
  0x3a   :  { %102 = vxpose.xlu0.b32.cont [15/16] %v82_v30, 128  ;;  %v2155_v30 = vld [vmem:[%s2676_s1 + $0x88] sm:$0xff] }
  0x3b   :  { %1569 = vmatprep.subr.mxu1 %v2155_v30 }
  0x3c   :  { %671 = vxpose.xlu1.b32.cont [12/16] %v1256_v55, 128  ;;  %1570 = vmatpush3.msra.mxu1 %v2155_v30  ;;  %v2238_v55 = vld [vmem:[%s2676_s1 + $0x128] sm:$0xff] }
  0x3e   :  { %103 = vxpose.xlu0.b32.end [16/16] %v83_v31, 128  ;;  %v2160_v31 = vld [vmem:[%s2676_s1 + $0x80] sm:$0xff] }
  0x3f   :  { %1571 = vmatprep.subr.mxu1 %v2160_v31 }
  0x40   :  { %672 = vxpose.xlu1.b32.cont [13/16] %v1257_v56, 128  ;;  %1572 = vmatpush3.msra.mxu1 %v2160_v31  ;;  %v2245_v56 = vld [vmem:[%s2676_s1 + $0x120] sm:$0xff] }
  0x41   :  { %1653 = vmatprep.subr.mxu1 %v1855_v2 }
  0x44   :  { %673 = vxpose.xlu1.b32.cont [14/16] %v1258_v57, 128  ;;  %v2248_v57 = vshrl.u32 %v84_v54, 7 }
  0x48   :  { %674 = vxpose.xlu1.b32.cont [15/16] %v1259_v58, 128  ;;  %v86_v58 = vsub.s32 0, %v2248_v57 }
  0x4c   :  { %675 = vxpose.xlu1.b32.end [16/16] %v1260_v59, 128  ;;  %v2257_v59 = vld [vmem:[%s2677_s2] sm:$0x7] }
  0x7e   :  { %v104_v60 = vpop.trf.xlu0 }
  0x7f   :  { %1517 = vmatprep.mubr.f32.mxu0 %v104_v60  ;;  %v2260_v60 = vrot.slane %v2257_v59, %v86_v58 }
  0x82   :  { %v105_v61 = vpop.trf.xlu0 }
  0x83   :  { %1518 = vmatmul.mubr.f32.vlgmr.msra.gmra.mxu0 %v105_v61 }
  0x84   :  { %1598 = vmatpush3.msra.mxu0 %v2170_v32 }
  0x85   :  { %1599 = vmatprep.subr.mxu0 %v2175_v33 }
  0x86   :  { %v106_v62 = vpop.trf.xlu0  ;;  %1600 = vmatpush3.msra.mxu0 %v2175_v33 }
  0x87   :  { %1520 = vmatprep.mubr.f32.mxu0 %v106_v62  ;;  %1601 = vmatprep.subr.mxu0 %v2182_v36 }
  0x88   :  { %1602 = vmatpush3.msra.mxu0 %v2182_v36 }
  0x89   :  { %1603 = vmatprep.subr.mxu0 %v2189_v39 }
  0x8a   :  { %v107_v63 = vpop.trf.xlu0  ;;  %1604 = vmatpush3.msra.mxu0 %v2189_v39 }
  0x8b   :  { %1521 = vmatmul.mubr.f32.gmra.mxu0 %v107_v63  ;;  %1605 = vmatprep.subr.mxu0 %v2196_v42 }
  0x8c   :  { %1606 = vmatpush3.msra.mxu0 %v2196_v42 }
  0x8d   :  { %1607 = vmatprep.subr.mxu0 %v2203_v45 }
  0x8e   :  { %v108_v0 = vpop.trf.xlu0  ;;  %1608 = vmatpush3.msra.mxu0 %v2203_v45 }
  0x8f   :  { %1523 = vmatprep.mubr.f32.mxu0 %v108_v0  ;;  %1609 = vmatprep.subr.mxu0 %v2210_v48 }
  0x90   :  { %1610 = vmatpush3.msra.mxu0 %v2210_v48 }
  0x91   :  { %1611 = vmatprep.subr.mxu0 %v2217_v51 }
  0x92   :  { %v109_v1 = vpop.trf.xlu0  ;;  %1612 = vmatpush3.msra.mxu0 %v2217_v51 }
  0x93   :  { %1524 = vmatmul.mubr.f32.gmra.mxu0 %v109_v1  ;;  %1613 = vmatprep.subr.mxu0 %v2224_v52  ;;  %v2264_v1 = vpop.trf.xlu1 }
  0x94   :  { %1614 = vmatpush3.msra.mxu0 %v2224_v52 }
  0x95   :  { %1615 = vmatprep.subr.mxu0 %v2231_v53 }
  0x96   :  { %v110_v4 = vpop.trf.xlu0  ;;  %1616 = vmatpush3.msra.mxu0 %v2231_v53 }
  0x97   :  { %1526 = vmatprep.mubr.f32.mxu0 %v110_v4  ;;  %1617 = vmatprep.subr.mxu0 %v2238_v55 }
  0x98   :  { %1618 = vmatpush3.msra.mxu0 %v2238_v55 }
  0x99   :  { %1619 = vmatprep.subr.mxu0 %v2245_v56 }
  0x9a   :  { %v111_v7 = vpop.trf.xlu0  ;;  %1620 = vmatpush3.msra.mxu0 %v2245_v56 }
  0x9b   :  { %1527 = vmatmul.mubr.f32.gmra.mxu0 %v111_v7 }
  0x9e   :  { %v112_v10 = vpop.trf.xlu0 }
  0x9f   :  { %1529 = vmatprep.mubr.f32.mxu0 %v112_v10 }
  0xa2   :  { %v113_v13 = vpop.trf.xlu0 }
  0xa3   :  { %1530 = vmatmul.mubr.f32.gmra.mxu0 %v113_v13  ;;  %v2267_v13 = vpop.trf.xlu1 }
  0xa6   :  { %v114_v16 = vpop.trf.xlu0 }
  0xa7   :  { %1532 = vmatprep.mubr.f32.mxu0 %v114_v16 }
  0xaa   :  { %v115_v19 = vpop.trf.xlu0 }
  0xab   :  { %1533 = vmatmul.mubr.f32.gmra.mxu0 %v115_v19 }
  0xae   :  { %v116_v22 = vpop.trf.xlu0 }
  0xaf   :  { %1535 = vmatprep.mubr.f32.mxu0 %v116_v22 }
  0xb2   :  { %v117_v25 = vpop.trf.xlu0 }
  0xb3   :  { %1536 = vmatmul.mubr.f32.gmra.mxu0 %v117_v25 }
  0xb6   :  { %v118_v26 = vpop.trf.xlu0 }
  0xb7   :  { %1538 = vmatprep.mubr.f32.mxu0 %v118_v26 }
  0xba   :  { %v119_v27 = vpop.trf.xlu0 }
  0xbb   :  { %1539 = vmatmul.mubr.f32.gmra.mxu0 %v119_v27 }
 0x143   :  { %v1519_v61 = vpop.f32.mrf.mxu0 }
 0x144   :  { %v192_v62 = vadd.f32 %v1519_v61, %v2260_v60 }
 0x145   :  { %v186_v63 = vpop.f32.mrf.mxu0 }
 0x146   :  { %v187_v0 = vadd.f32 %v186_v63, %v2260_v60  ;;  %v266_v7 = vmax.f32 %v192_v62, 0.0 }
 0x148   :  { %v265_v4 = vmax.f32 %v187_v0, 0.0 }
 0x14a   :  { %1573 = vmatprep.mubr.f32.mxu1 %v265_v4 }
 0x14b   :  { %v1522_v10 = vpop.f32.mrf.mxu0  ;;  %1574 = vmatmul.mubr.f32.vlgmr.msra.gmra.mxu1 %v266_v7 }
 0x14c   :  { %1654 = vmatpush3.msra.mxu1 %v1855_v2  ;;  %v202_v16 = vadd.f32 %v1522_v10, %v2260_v60  ;;  %v2277_v2 = vpop.trf.xlu1 }
 0x14d   :  { %v196_v19 = vpop.f32.mrf.mxu0  ;;  %1655 = vmatprep.subr.mxu1 %v1860_v3 }
 0x14e   :  { %v197_v22 = vadd.f32 %v196_v19, %v2260_v60  ;;  %1656 = vmatpush3.msra.mxu1 %v1860_v3  ;;  %v268_v26 = vmax.f32 %v202_v16, 0.0 }
 0x14f   :  { %1657 = vmatprep.subr.mxu1 %v1870_v5 }
 0x150   :  { %v267_v25 = vmax.f32 %v197_v22, 0.0  ;;  %1658 = vmatpush3.msra.mxu1 %v1870_v5  ;;  %v2286_v58 = vpop.trf.xlu1 }
 0x151   :  { %1659 = vmatprep.subr.mxu1 %v1877_v6 }
 0x152   :  { %1576 = vmatprep.mubr.f32.mxu1 %v267_v25  ;;  %1660 = vmatpush3.msra.mxu1 %v1877_v6 }
 0x153   :  { %v1525_v27 = vpop.f32.mrf.mxu0  ;;  %1577 = vmatmul.mubr.f32.gmra.mxu1 %v268_v26  ;;  %1661 = vmatprep.subr.mxu1 %v1887_v8 }
 0x154   :  { %1662 = vmatpush3.msra.mxu1 %v1887_v8  ;;  %v212_v3 = vadd.f32 %v1525_v27, %v2260_v60 }
 0x155   :  { %v206_v54 = vpop.f32.mrf.mxu0  ;;  %1663 = vmatprep.subr.mxu1 %v1894_v9 }
 0x156   :  { %v207_v5 = vadd.f32 %v206_v54, %v2260_v60  ;;  %1664 = vmatpush3.msra.mxu1 %v1894_v9  ;;  %v270_v61 = vmax.f32 %v212_v3, 0.0 }
 0x157   :  { %1665 = vmatprep.subr.mxu1 %v1904_v11 }
 0x158   :  { %v269_v6 = vmax.f32 %v207_v5, 0.0  ;;  %1666 = vmatpush3.msra.mxu1 %v1904_v11  ;;  %v2296_v11 = vpop.trf.xlu1 }
 0x159   :  { %1667 = vmatprep.subr.mxu1 %v1911_v12 }
 0x15a   :  { %1579 = vmatprep.mubr.f32.mxu1 %v269_v6  ;;  %1668 = vmatpush3.msra.mxu1 %v1911_v12 }
 0x15b   :  { %v1528_v8 = vpop.f32.mrf.mxu0  ;;  %1580 = vmatmul.mubr.f32.gmra.mxu1 %v270_v61  ;;  %1669 = vmatprep.subr.mxu1 %v1921_v14 }
 0x15c   :  { %1670 = vmatpush3.msra.mxu1 %v1921_v14  ;;  %v222_v9 = vadd.f32 %v1528_v8, %v2260_v60  ;;  %v2304_v4 = vpop.trf.xlu1 }
 0x15d   :  { %v216_v62 = vpop.f32.mrf.mxu0  ;;  %1671 = vmatprep.subr.mxu1 %v1928_v15 }
 0x15e   :  { %v217_v63 = vadd.f32 %v216_v62, %v2260_v60  ;;  %1672 = vmatpush3.msra.mxu1 %v1928_v15  ;;  %v272_v0 = vmax.f32 %v222_v9, 0.0 }
 0x15f   :  { %1673 = vmatprep.subr.mxu1 %v1938_v17 }
 0x160   :  { %v271_v12 = vmax.f32 %v217_v63, 0.0  ;;  %1674 = vmatpush3.msra.mxu1 %v1938_v17  ;;  %v682_v16 = vpop.trf.xlu1 }
 0x161   :  { %1675 = vmatprep.subr.mxu1 %v1945_v18 }
 0x162   :  { %1582 = vmatprep.mubr.f32.mxu1 %v271_v12  ;;  %1676 = vmatpush3.msra.mxu1 %v1945_v18 }
 0x163   :  { %v1531_v14 = vpop.f32.mrf.mxu0  ;;  %1583 = vmatmul.mubr.f32.gmra.mxu1 %v272_v0  ;;  %1677 = vmatprep.subr.mxu1 %v1955_v20 }
 0x164   :  { %1678 = vmatpush3.msra.mxu1 %v1955_v20  ;;  %v232_v15 = vadd.f32 %v1531_v14, %v2260_v60  ;;  %v683_v26 = vpop.trf.xlu1 }
 0x165   :  { %v226_v7 = vpop.f32.mrf.mxu0  ;;  %1679 = vmatprep.subr.mxu1 %v1962_v21 }
 0x166   :  { %v227_v17 = vadd.f32 %v226_v7, %v2260_v60  ;;  %1680 = vmatpush3.msra.mxu1 %v1962_v21  ;;  %v274_v10 = vmax.f32 %v232_v15, 0.0 }
 0x167   :  { %1681 = vmatprep.subr.mxu1 %v1972_v23 }
 0x168   :  { %v273_v18 = vmax.f32 %v227_v17, 0.0  ;;  %1682 = vmatpush3.msra.mxu1 %v1972_v23  ;;  %v684_v5 = vpop.trf.xlu1  ;;  %v1232_v17 = vld [vmem:[%s2676_s1 + $0x118] sm:$0xff] }
 0x169   :  { %1683 = vmatprep.subr.mxu1 %v1979_v24  ;;  %1621 = vmatprep.subr.mxu0 %v1232_v17 }
 0x16a   :  { %1585 = vmatprep.mubr.f32.mxu1 %v273_v18  ;;  %1684 = vmatpush3.msra.mxu1 %v1979_v24 }
 0x16b   :  { %v1534_v20 = vpop.f32.mrf.mxu0  ;;  %1586 = vmatmul.mubr.f32.gmra.mxu1 %v274_v10  ;;  %1765 = vmatprep.subr.mxu1 %v2170_v32 }
 0x16c   :  { %v242_v19 = vadd.f32 %v1534_v20, %v2260_v60  ;;  %v685_v9 = vpop.trf.xlu1  ;;  %1622 = vmatpush3.msra.mxu0 %v1232_v17 }
 0x16d   :  { %v236_v22 = vpop.f32.mrf.mxu0 }
 0x16e   :  { %v237_v21 = vadd.f32 %v236_v22, %v2260_v60  ;;  %v276_v27 = vmax.f32 %v242_v19, 0.0 }
 0x170   :  { %v275_v25 = vmax.f32 %v237_v21, 0.0  ;;  %v686_v15 = vpop.trf.xlu1 }
 0x172   :  { %1588 = vmatprep.mubr.f32.mxu1 %v275_v25 }
 0x173   :  { %v1537_v23 = vpop.f32.mrf.mxu0  ;;  %1589 = vmatmul.mubr.f32.gmra.mxu1 %v276_v27 }
 0x174   :  { %v252_v3 = vadd.f32 %v1537_v23, %v2260_v60  ;;  %v687_v7 = vpop.trf.xlu1 }
 0x175   :  { %v246_v54 = vpop.f32.mrf.mxu0 }
 0x176   :  { %v247_v24 = vadd.f32 %v246_v54, %v2260_v60  ;;  %v278_v61 = vmax.f32 %v252_v3, 0.0 }
 0x178   :  { %v277_v6 = vmax.f32 %v247_v24, 0.0 }
 0x17a   :  { %1591 = vmatprep.mubr.f32.mxu1 %v277_v6 }
 0x17b   :  { %v1540_v8 = vpop.f32.mrf.mxu0  ;;  %1592 = vmatmul.mubr.f32.gmra.mxu1 %v278_v61 }
 0x17c   :  { %v262_v62 = vadd.f32 %v1540_v8, %v2260_v60 }
 0x17d   :  { %v256_v63 = vpop.f32.mrf.mxu0 }
 0x17e   :  { %v257_v12 = vadd.f32 %v256_v63, %v2260_v60  ;;  %v280_v14 = vmax.f32 %v262_v62, 0.0 }
 0x180   :  { %v279_v0 = vmax.f32 %v257_v12, 0.0 }
 0x182   :  { %1594 = vmatprep.mubr.f32.mxu1 %v279_v0 }
 0x183   :  { %1595 = vmatmul.mubr.f32.gmra.mxu1 %v280_v14 }
 0x184   :  { %1685 = vmatprep.mubr.f32.mxu1 %v2264_v1  ;;  %v1231_v1 = vld [vmem:[%s2676_s1 + $0x110] sm:$0xff] }
 0x185   :  { %1623 = vmatprep.subr.mxu0 %v1231_v1 }
 0x186   :  { %1624 = vmatpush3.msra.mxu0 %v1231_v1 }
 0x187   :  { %1686 = vmatmul.mubr.f32.vlgmr.msra.gmra.mxu1 %v2267_v13  ;;  %v1230_v13 = vld [vmem:[%s2676_s1 + $0x108] sm:$0xff] }
 0x188   :  { %1688 = vmatprep.mubr.f32.mxu1 %v2277_v2  ;;  %1766 = vmatpush3.msra.mxu1 %v2170_v32  ;;  %v688_v32 = vpop.trf.xlu1 }
 0x189   :  { %1767 = vmatprep.subr.mxu1 %v2175_v33  ;;  %1625 = vmatprep.subr.mxu0 %v1230_v13 }
 0x18a   :  { %1768 = vmatpush3.msra.mxu1 %v2175_v33  ;;  %1626 = vmatpush3.msra.mxu0 %v1230_v13  ;;  %v1229_v33 = vld [vmem:[%s2676_s1 + $0x100] sm:$0xff] }
 0x18b   :  { %1689 = vmatmul.mubr.f32.gmra.mxu1 %v2286_v58  ;;  %1769 = vmatprep.subr.mxu1 %v2182_v36 }
 0x18c   :  { %1691 = vmatprep.mubr.f32.mxu1 %v2296_v11  ;;  %1770 = vmatpush3.msra.mxu1 %v2182_v36  ;;  %v689_v36 = vpop.trf.xlu1 }
 0x18d   :  { %1627 = vmatprep.subr.mxu0 %v1229_v33  ;;  %1771 = vmatprep.subr.mxu1 %v2189_v39 }
 0x18e   :  { %1628 = vmatpush3.msra.mxu0 %v1229_v33  ;;  %1772 = vmatpush3.msra.mxu1 %v2189_v39 }
 0x18f   :  { %1692 = vmatmul.mubr.f32.gmra.mxu1 %v2304_v4  ;;  %1709 = vmatprep.subr.mxu0 %v2015_v34 }
 0x190   :  { %1694 = vmatprep.mubr.f32.mxu1 %v682_v16  ;;  %1773 = vmatprep.subr.mxu1 %v2196_v42  ;;  %v690_v2 = vpop.trf.xlu1 }
 0x191   :  { %1774 = vmatpush3.msra.mxu1 %v2196_v42  ;;  %v283_v42 = vsub.s32 1, %v2248_v57 }
 0x192   :  { %1775 = vmatprep.subr.mxu1 %v2203_v45 }
 0x193   :  { %1695 = vmatmul.mubr.f32.gmra.mxu1 %v683_v26 }
 0x194   :  { %1697 = vmatprep.mubr.f32.mxu1 %v684_v5  ;;  %1776 = vmatpush3.msra.mxu1 %v2203_v45  ;;  %v691_v39 = vpop.trf.xlu1  ;;  %v2366_v45 = vrot.slane %v2257_v59, %v283_v42 }
 0x195   :  { %1777 = vmatprep.subr.mxu1 %v2210_v48 }
 0x196   :  { %1778 = vmatpush3.msra.mxu1 %v2210_v48 }
 0x197   :  { %1698 = vmatmul.mubr.f32.gmra.mxu1 %v685_v9  ;;  %1779 = vmatprep.subr.mxu1 %v2217_v51 }
 0x198   :  { %1700 = vmatprep.mubr.f32.mxu1 %v686_v15  ;;  %1780 = vmatpush3.msra.mxu1 %v2217_v51 }
 0x199   :  { %1781 = vmatprep.subr.mxu1 %v2224_v52 }
 0x19a   :  { %1782 = vmatpush3.msra.mxu1 %v2224_v52 }
 0x19b   :  { %1701 = vmatmul.mubr.f32.gmra.mxu1 %v687_v7  ;;  %1783 = vmatprep.subr.mxu1 %v2231_v53 }
 0x19c   :  { %1703 = vmatprep.mubr.f32.mxu1 %v688_v32  ;;  %1784 = vmatpush3.msra.mxu1 %v2231_v53 }
 0x19d   :  { %1785 = vmatprep.subr.mxu1 %v2238_v55 }
 0x19e   :  { %1786 = vmatpush3.msra.mxu1 %v2238_v55 }
 0x19f   :  { %1704 = vmatmul.mubr.f32.gmra.mxu1 %v689_v36  ;;  %1787 = vmatprep.subr.mxu1 %v2245_v56 }
 0x1a0   :  { %1706 = vmatprep.mubr.f32.mxu1 %v690_v2  ;;  %1788 = vmatpush3.msra.mxu1 %v2245_v56 }
 0x1a1   :  { %1789 = vmatprep.subr.mxu1 %v1232_v17 }
 0x1a2   :  { %1790 = vmatpush3.msra.mxu1 %v1232_v17 }
 0x1a3   :  { %1707 = vmatmul.mubr.f32.gmra.mxu1 %v691_v39  ;;  %1791 = vmatprep.subr.mxu1 %v1231_v1 }
 0x1a4   :  { %1792 = vmatpush3.msra.mxu1 %v1231_v1 }
 0x1a5   :  { %1793 = vmatprep.subr.mxu1 %v1230_v13 }
 0x1a6   :  { %1794 = vmatpush3.msra.mxu1 %v1230_v13 }
 0x1a7   :  { %1795 = vmatprep.subr.mxu1 %v1229_v33 }
 0x1a8   :  { %1796 = vmatpush3.msra.mxu1 %v1229_v33 }
 0x20b   :  { %v1575_v48 = vpop.f32.mrf.mxu1 }
 0x20c   :  { %v357_v51 = vadd.f32 %v1575_v48, %v2366_v45 }
 0x20d   :  { %v351_v52 = vpop.f32.mrf.mxu1 }
 0x20e   :  { %v352_v53 = vadd.f32 %v351_v52, %v2366_v45  ;;  %v431_v56 = vmax.f32 %v357_v51, 0.0 }
 0x210   :  { %v430_v55 = vmax.f32 %v352_v53, 0.0 }
 0x212   :  { %1629 = vmatprep.mubr.f32.mxu0 %v430_v55 }
 0x213   :  { %v1578_v58 = vpop.f32.mrf.mxu1  ;;  %1630 = vmatmul.mubr.f32.vlgmr.msra.gmra.mxu0 %v431_v56 }
 0x214   :  { %1710 = vmatpush3.msra.mxu0 %v2015_v34  ;;  %v367_v11 = vadd.f32 %v1578_v58, %v2366_v45 }
 0x215   :  { %v361_v4 = vpop.f32.mrf.mxu1  ;;  %1711 = vmatprep.subr.mxu0 %v2020_v35 }
 0x216   :  { %v362_v18 = vadd.f32 %v361_v4, %v2366_v45  ;;  %1712 = vmatpush3.msra.mxu0 %v2020_v35  ;;  %v433_v16 = vmax.f32 %v367_v11, 0.0 }
 0x217   :  { %1713 = vmatprep.subr.mxu0 %v2030_v37 }
 0x218   :  { %v432_v10 = vmax.f32 %v362_v18, 0.0  ;;  %1714 = vmatpush3.msra.mxu0 %v2030_v37 }
 0x219   :  { %1715 = vmatprep.subr.mxu0 %v2037_v38 }
 0x21a   :  { %1632 = vmatprep.mubr.f32.mxu0 %v432_v10  ;;  %1716 = vmatpush3.msra.mxu0 %v2037_v38 }
 0x21b   :  { %v1581_v34 = vpop.f32.mrf.mxu1  ;;  %1633 = vmatmul.mubr.f32.gmra.mxu0 %v433_v16  ;;  %1717 = vmatprep.subr.mxu0 %v2047_v40 }
 0x21c   :  { %1718 = vmatpush3.msra.mxu0 %v2047_v40  ;;  %v377_v20 = vadd.f32 %v1581_v34, %v2366_v45 }
 0x21d   :  { %v371_v35 = vpop.f32.mrf.mxu1  ;;  %1719 = vmatprep.subr.mxu0 %v2054_v41 }
 0x21e   :  { %v372_v19 = vadd.f32 %v371_v35, %v2366_v45  ;;  %1720 = vmatpush3.msra.mxu0 %v2054_v41  ;;  %v435_v38 = vmax.f32 %v377_v20, 0.0 }
 0x21f   :  { %1721 = vmatprep.subr.mxu0 %v2064_v43 }
 0x220   :  { %v434_v37 = vmax.f32 %v372_v19, 0.0  ;;  %1722 = vmatpush3.msra.mxu0 %v2064_v43 }
 0x221   :  { %1723 = vmatprep.subr.mxu0 %v2071_v44 }
 0x222   :  { %1635 = vmatprep.mubr.f32.mxu0 %v434_v37  ;;  %1724 = vmatpush3.msra.mxu0 %v2071_v44 }
 0x223   :  { %v1584_v40 = vpop.f32.mrf.mxu1  ;;  %1636 = vmatmul.mubr.f32.gmra.mxu0 %v435_v38  ;;  %1725 = vmatprep.subr.mxu0 %v2081_v46 }
 0x224   :  { %1726 = vmatpush3.msra.mxu0 %v2081_v46  ;;  %v387_v22 = vadd.f32 %v1584_v40, %v2366_v45 }
 0x225   :  { %v381_v41 = vpop.f32.mrf.mxu1  ;;  %1727 = vmatprep.subr.mxu0 %v2088_v47 }
 0x226   :  { %v382_v21 = vadd.f32 %v381_v41, %v2366_v45  ;;  %1728 = vmatpush3.msra.mxu0 %v2088_v47  ;;  %v437_v44 = vmax.f32 %v387_v22, 0.0 }
 0x227   :  { %1729 = vmatprep.subr.mxu0 %v2098_v49 }
 0x228   :  { %v436_v43 = vmax.f32 %v382_v21, 0.0  ;;  %1730 = vmatpush3.msra.mxu0 %v2098_v49 }
 0x229   :  { %1731 = vmatprep.subr.mxu0 %v2105_v50 }
 0x22a   :  { %1638 = vmatprep.mubr.f32.mxu0 %v436_v43  ;;  %1732 = vmatpush3.msra.mxu0 %v2105_v50 }
 0x22b   :  { %v1587_v46 = vpop.f32.mrf.mxu1  ;;  %1639 = vmatmul.mubr.f32.gmra.mxu0 %v437_v44  ;;  %1733 = vmatprep.subr.mxu0 %v2141_v28 }
 0x22c   :  { %1734 = vmatpush3.msra.mxu0 %v2141_v28  ;;  %v397_v25 = vadd.f32 %v1587_v46, %v2366_v45 }
 0x22d   :  { %v391_v47 = vpop.f32.mrf.mxu1  ;;  %1735 = vmatprep.subr.mxu0 %v2148_v29 }
 0x22e   :  { %v392_v26 = vadd.f32 %v391_v47, %v2366_v45  ;;  %1736 = vmatpush3.msra.mxu0 %v2148_v29  ;;  %v439_v50 = vmax.f32 %v397_v25, 0.0 }
 0x22f   :  { %1737 = vmatprep.subr.mxu0 %v2155_v30 }
 0x230   :  { %v438_v49 = vmax.f32 %v392_v26, 0.0  ;;  %1738 = vmatpush3.msra.mxu0 %v2155_v30 }
 0x231   :  { %1739 = vmatprep.subr.mxu0 %v2160_v31 }
 0x232   :  { %1641 = vmatprep.mubr.f32.mxu0 %v438_v49  ;;  %1740 = vmatpush3.msra.mxu0 %v2160_v31 }
 0x233   :  { %v1590_v28 = vpop.f32.mrf.mxu1  ;;  %1642 = vmatmul.mubr.f32.gmra.mxu0 %v439_v50 }
 0x234   :  { %v407_v27 = vadd.f32 %v1590_v28, %v2366_v45 }
 0x235   :  { %v401_v23 = vpop.f32.mrf.mxu1 }
 0x236   :  { %v402_v3 = vadd.f32 %v401_v23, %v2366_v45  ;;  %v441_v29 = vmax.f32 %v407_v27, 0.0 }
 0x238   :  { %v440_v54 = vmax.f32 %v402_v3, 0.0 }
 0x23a   :  { %1644 = vmatprep.mubr.f32.mxu0 %v440_v54 }
 0x23b   :  { %v1593_v24 = vpop.f32.mrf.mxu1  ;;  %1645 = vmatmul.mubr.f32.gmra.mxu0 %v441_v29 }
 0x23c   :  { %v417_v30 = vadd.f32 %v1593_v24, %v2366_v45  ;;  %v448_v24 = vsub.s32 2, %v2248_v57 }
 0x23d   :  { %v411_v5 = vpop.f32.mrf.mxu1 }
 0x23e   :  { %v412_v6 = vadd.f32 %v411_v5, %v2366_v45  ;;  %v443_v8 = vmax.f32 %v417_v30, 0.0  ;;  %v2433_v30 = vrot.slane %v2257_v59, %v448_v24 }
 0x240   :  { %v442_v61 = vmax.f32 %v412_v6, 0.0  ;;  %v596_v6 = vld [vmem:[%s2678_s3 + $0x8] sm:$0xff] }
 0x242   :  { %1647 = vmatprep.mubr.f32.mxu0 %v442_v61 }
 0x243   :  { %v1596_v31 = vpop.f32.mrf.mxu1  ;;  %1648 = vmatmul.mubr.f32.gmra.mxu0 %v443_v8 }
 0x244   :  { %v427_v9 = vadd.f32 %v1596_v31, %v2366_v45 }
 0x245   :  { %v421_v62 = vpop.f32.mrf.mxu1 }
 0x246   :  { %v422_v63 = vadd.f32 %v421_v62, %v2366_v45  ;;  %v445_v14 = vmax.f32 %v427_v9, 0.0  ;;  %v598_v62 = vld [vmem:[%s2678_s3 + $0x18] sm:$0xff] }
 0x247   :  { %v1687_v12 = vpop.f32.mrf.mxu1 }
 0x248   :  { %v444_v0 = vmax.f32 %v422_v63, 0.0  ;;  %v764_v15 = vadd.f32 %v1687_v12, %v2260_v60 }
 0x249   :  { %v758_v7 = vpop.f32.mrf.mxu1 }
 0x24a   :  { %v759_v17 = vadd.f32 %v758_v7, %v2260_v60  ;;  %1650 = vmatprep.mubr.f32.mxu0 %v444_v0  ;;  %v838_v13 = vmax.f32 %v764_v15, 0.0  ;;  %v597_v0 = vld [vmem:[%s2678_s3 + $0x10] sm:$0xff] }
 0x24b   :  { %1651 = vmatmul.mubr.f32.gmra.mxu0 %v445_v14  ;;  %v1690_v1 = vpop.f32.mrf.mxu1 }
 0x24c   :  { %v837_v32 = vmax.f32 %v759_v17, 0.0  ;;  %v774_v33 = vadd.f32 %v1690_v1, %v2260_v60  ;;  %v600_v1 = vld [vmem:[%s2678_s3 + $0x28] sm:$0xff] }
 0x24d   :  { %v768_v36 = vpop.f32.mrf.mxu1 }
 0x24e   :  { %v769_v2 = vadd.f32 %v768_v36, %v2260_v60  ;;  %1741 = vmatprep.mubr.f32.mxu0 %v837_v32  ;;  %v840_v48 = vmax.f32 %v774_v33, 0.0  ;;  %v599_v33 = vld [vmem:[%s2678_s3 + $0x20] sm:$0xff] }
 0x24f   :  { %v1693_v39 = vpop.f32.mrf.mxu1  ;;  %1742 = vmatmul.mubr.f32.vlgmr.msra.gmra.mxu0 %v838_v13 }
 0x250   :  { %v839_v42 = vmax.f32 %v769_v2, 0.0  ;;  %v784_v51 = vadd.f32 %v1693_v39, %v2260_v60 }
 0x251   :  { %v778_v52 = vpop.f32.mrf.mxu1 }
 0x252   :  { %v779_v53 = vadd.f32 %v778_v52, %v2260_v60  ;;  %1744 = vmatprep.mubr.f32.mxu0 %v839_v42  ;;  %v842_v58 = vmax.f32 %v784_v51, 0.0 }
 0x253   :  { %v1696_v55 = vpop.f32.mrf.mxu1  ;;  %1745 = vmatmul.mubr.f32.gmra.mxu0 %v840_v48  ;;  %v602_v48 = vld [vmem:[%s2678_s3 + $0x38] sm:$0xff] }
 0x254   :  { %v841_v56 = vmax.f32 %v779_v53, 0.0  ;;  %v794_v11 = vadd.f32 %v1696_v55, %v2260_v60  ;;  %v601_v53 = vld [vmem:[%s2678_s3 + $0x30] sm:$0xff] }
 0x255   :  { %v788_v4 = vpop.f32.mrf.mxu1 }
 0x256   :  { %v789_v18 = vadd.f32 %v788_v4, %v2260_v60  ;;  %1747 = vmatprep.mubr.f32.mxu0 %v841_v56  ;;  %v844_v34 = vmax.f32 %v794_v11, 0.0  ;;  %v604_v4 = vld [vmem:[%s2678_s3 + $0x48] sm:$0xff] }
 0x257   :  { %v1699_v10 = vpop.f32.mrf.mxu1  ;;  %1748 = vmatmul.mubr.f32.gmra.mxu0 %v842_v58 }
 0x258   :  { %v843_v16 = vmax.f32 %v789_v18, 0.0  ;;  %v804_v20 = vadd.f32 %v1699_v10, %v2260_v60 }
 0x259   :  { %v798_v35 = vpop.f32.mrf.mxu1 }
 0x25a   :  { %v799_v19 = vadd.f32 %v798_v35, %v2260_v60  ;;  %1750 = vmatprep.mubr.f32.mxu0 %v843_v16  ;;  %v846_v40 = vmax.f32 %v804_v20, 0.0  ;;  %v603_v16 = vld [vmem:[%s2678_s3 + $0x40] sm:$0xff] }
 0x25b   :  { %v1702_v37 = vpop.f32.mrf.mxu1  ;;  %1751 = vmatmul.mubr.f32.gmra.mxu0 %v844_v34 }
 0x25c   :  { %v845_v38 = vmax.f32 %v799_v19, 0.0  ;;  %v814_v22 = vadd.f32 %v1702_v37, %v2260_v60  ;;  %v606_v37 = vld [vmem:[%s2678_s3 + $0x58] sm:$0xff] }
 0x25d   :  { %v808_v41 = vpop.f32.mrf.mxu1 }
 0x25e   :  { %v809_v21 = vadd.f32 %v808_v41, %v2260_v60  ;;  %1753 = vmatprep.mubr.f32.mxu0 %v845_v38  ;;  %v848_v46 = vmax.f32 %v814_v22, 0.0  ;;  %v605_v22 = vld [vmem:[%s2678_s3 + $0x50] sm:$0xff] }
 0x25f   :  { %v1705_v43 = vpop.f32.mrf.mxu1  ;;  %1754 = vmatmul.mubr.f32.gmra.mxu0 %v846_v40 }
 0x260   :  { %v847_v44 = vmax.f32 %v809_v21, 0.0  ;;  %v824_v25 = vadd.f32 %v1705_v43, %v2260_v60 }
 0x261   :  { %v818_v47 = vpop.f32.mrf.mxu1 }
 0x262   :  { %v819_v26 = vadd.f32 %v818_v47, %v2260_v60  ;;  %1756 = vmatprep.mubr.f32.mxu0 %v847_v44  ;;  %v850_v28 = vmax.f32 %v824_v25, 0.0 }
 0x263   :  { %v1708_v49 = vpop.f32.mrf.mxu1  ;;  %1757 = vmatmul.mubr.f32.gmra.mxu0 %v848_v46  ;;  %v608_v46 = vld [vmem:[%s2678_s3 + $0x68] sm:$0xff] }
 0x264   :  { %v849_v50 = vmax.f32 %v819_v26, 0.0  ;;  %v834_v27 = vadd.f32 %v1708_v49, %v2260_v60  ;;  %v607_v26 = vld [vmem:[%s2678_s3 + $0x60] sm:$0xff] }
 0x265   :  { %v828_v23 = vpop.f32.mrf.mxu1 }
 0x266   :  { %v829_v3 = vadd.f32 %v828_v23, %v2260_v60  ;;  %1759 = vmatprep.mubr.f32.mxu0 %v849_v50  ;;  %v852_v29 = vmax.f32 %v834_v27, 0.0  ;;  %v595_v60 = vld [vmem:[%s2678_s3] sm:$0xff]  ;;  %v610_v23 = vld [vmem:[%s2678_s3 + $0x78] sm:$0xff] }
 0x267   :  { %1760 = vmatmul.mubr.f32.gmra.mxu0 %v850_v28 }
 0x268   :  { %v851_v54 = vmax.f32 %v829_v3, 0.0 }
 0x26a   :  { %1762 = vmatprep.mubr.f32.mxu0 %v851_v54 }
 0x26b   :  { %1763 = vmatmul.mubr.f32.gmra.mxu0 %v852_v29  ;;  %v609_v29 = vld [vmem:[%s2678_s3 + $0x70] sm:$0xff] }
 0x2d3   :  { %v1631_v5 = vpop.f32.mrf.mxu0 }
 0x2d4   :  { %v522_v61 = vadd.f32 %v1631_v5, %v2433_v30 }
 0x2d5   :  { %v516_v8 = vpop.f32.mrf.mxu0 }
 0x2d6   :  { %v612_v31 = vadd.f32 %v596_v6, %v522_v61  ;;  %v517_v9 = vadd.f32 %v516_v8, %v2433_v30 }
 0x2d8   :  { %628 = vst [vmem:[%s2679_s4 + $0x8] sm:$0xff] %v612_v31  ;;  %v611_v57 = vadd.f32 %v595_v60, %v517_v9 }
 0x2da   :  { %627 = vst [vmem:[%s2679_s4] sm:$0xff] %v611_v57 }
 0x2db   :  { %v1634_v59 = vpop.f32.mrf.mxu0 }
 0x2dc   :  { %v532_v63 = vadd.f32 %v1634_v59, %v2433_v30 }
 0x2dd   :  { %v526_v12 = vpop.f32.mrf.mxu0 }
 0x2de   :  { %v614_v14 = vadd.f32 %v598_v62, %v532_v63  ;;  %v527_v15 = vadd.f32 %v526_v12, %v2433_v30 }
 0x2e0   :  { %630 = vst [vmem:[%s2679_s4 + $0x18] sm:$0xff] %v614_v14  ;;  %v613_v7 = vadd.f32 %v597_v0, %v527_v15 }
 0x2e2   :  { %629 = vst [vmem:[%s2679_s4 + $0x10] sm:$0xff] %v613_v7 }
 0x2e3   :  { %v1637_v17 = vpop.f32.mrf.mxu0 }
 0x2e4   :  { %v542_v32 = vadd.f32 %v1637_v17, %v2433_v30 }
 0x2e5   :  { %v536_v13 = vpop.f32.mrf.mxu0 }
 0x2e6   :  { %v616_v36 = vadd.f32 %v600_v1, %v542_v32  ;;  %v537_v2 = vadd.f32 %v536_v13, %v2433_v30 }
 0x2e8   :  { %632 = vst [vmem:[%s2679_s4 + $0x28] sm:$0xff] %v616_v36  ;;  %v615_v39 = vadd.f32 %v599_v33, %v537_v2 }
 0x2ea   :  { %631 = vst [vmem:[%s2679_s4 + $0x20] sm:$0xff] %v615_v39 }
 0x2eb   :  { %v1640_v42 = vpop.f32.mrf.mxu0 }
 0x2ec   :  { %v552_v51 = vadd.f32 %v1640_v42, %v2433_v30 }
 0x2ed   :  { %v546_v52 = vpop.f32.mrf.mxu0 }
 0x2ee   :  { %v618_v55 = vadd.f32 %v602_v48, %v552_v51  ;;  %v547_v56 = vadd.f32 %v546_v52, %v2433_v30 }
 0x2f0   :  { %634 = vst [vmem:[%s2679_s4 + $0x38] sm:$0xff] %v618_v55  ;;  %v617_v58 = vadd.f32 %v601_v53, %v547_v56 }
 0x2f2   :  { %633 = vst [vmem:[%s2679_s4 + $0x30] sm:$0xff] %v617_v58 }
 0x2f3   :  { %v1643_v11 = vpop.f32.mrf.mxu0 }
 0x2f4   :  { %v562_v18 = vadd.f32 %v1643_v11, %v2433_v30 }
 0x2f5   :  { %v556_v10 = vpop.f32.mrf.mxu0 }
 0x2f6   :  { %v620_v34 = vadd.f32 %v604_v4, %v562_v18  ;;  %v557_v20 = vadd.f32 %v556_v10, %v2433_v30 }
 0x2f8   :  { %636 = vst [vmem:[%s2679_s4 + $0x48] sm:$0xff] %v620_v34  ;;  %v619_v35 = vadd.f32 %v603_v16, %v557_v20 }
 0x2fa   :  { %635 = vst [vmem:[%s2679_s4 + $0x40] sm:$0xff] %v619_v35 }
 0x2fb   :  { %v1646_v19 = vpop.f32.mrf.mxu0 }
 0x2fc   :  { %v572_v38 = vadd.f32 %v1646_v19, %v2433_v30 }
 0x2fd   :  { %v566_v40 = vpop.f32.mrf.mxu0 }
 0x2fe   :  { %v622_v41 = vadd.f32 %v606_v37, %v572_v38  ;;  %v567_v21 = vadd.f32 %v566_v40, %v2433_v30 }
 0x300   :  { %638 = vst [vmem:[%s2679_s4 + $0x58] sm:$0xff] %v622_v41  ;;  %v621_v43 = vadd.f32 %v605_v22, %v567_v21 }
 0x302   :  { %637 = vst [vmem:[%s2679_s4 + $0x50] sm:$0xff] %v621_v43 }
 0x303   :  { %v1649_v44 = vpop.f32.mrf.mxu0 }
 0x304   :  { %v582_v25 = vadd.f32 %v1649_v44, %v2433_v30 }
 0x305   :  { %v576_v47 = vpop.f32.mrf.mxu0 }
 0x306   :  { %v624_v49 = vadd.f32 %v608_v46, %v582_v25  ;;  %v577_v50 = vadd.f32 %v576_v47, %v2433_v30  ;;  %v1262_v47 = vld [vmem:[%s2678_s3 + $0x88] sm:$0xff] }
 0x308   :  { %640 = vst [vmem:[%s2679_s4 + $0x68] sm:$0xff] %v624_v49  ;;  %v623_v28 = vadd.f32 %v607_v26, %v577_v50  ;;  %v1261_v50 = vld [vmem:[%s2678_s3 + $0x80] sm:$0xff] }
 0x30a   :  { %639 = vst [vmem:[%s2679_s4 + $0x60] sm:$0xff] %v623_v28 }
 0x30b   :  { %v1652_v27 = vpop.f32.mrf.mxu0 }
 0x30c   :  { %v592_v3 = vadd.f32 %v1652_v27, %v2433_v30 }
 0x30d   :  { %v586_v54 = vpop.f32.mrf.mxu0 }
 0x30e   :  { %v626_v24 = vadd.f32 %v610_v23, %v592_v3  ;;  %v587_v5 = vadd.f32 %v586_v54, %v2433_v30  ;;  %v1264_v23 = vld [vmem:[%s2678_s3 + $0x98] sm:$0xff] }
 0x30f   :  { %v1743_v6 = vpop.f32.mrf.mxu0 }
 0x310   :  { %642 = vst [vmem:[%s2679_s4 + $0x78] sm:$0xff] %v626_v24  ;;  %v625_v61 = vadd.f32 %v609_v29, %v587_v5  ;;  %v925_v8 = vadd.f32 %v1743_v6, %v2366_v45  ;;  %v1263_v24 = vld [vmem:[%s2678_s3 + $0x90] sm:$0xff] }
 0x311   :  { %v919_v60 = vpop.f32.mrf.mxu0 }
 0x312   :  { %641 = vst [vmem:[%s2679_s4 + $0x70] sm:$0xff] %v625_v61  ;;  %v920_v31 = vadd.f32 %v919_v60, %v2366_v45  ;;  %v999_v59 = vmax.f32 %v925_v8, 0.0  ;;  %v1266_v8 = vld [vmem:[%s2678_s3 + $0xa8] sm:$0xff] }
 0x313   :  { %v1746_v9 = vpop.f32.mrf.mxu0 }
 0x314   :  { %v998_v57 = vmax.f32 %v920_v31, 0.0  ;;  %v935_v62 = vadd.f32 %v1746_v9, %v2366_v45 }
 0x315   :  { %v929_v63 = vpop.f32.mrf.mxu0 }
 0x316   :  { %v930_v12 = vadd.f32 %v929_v63, %v2366_v45  ;;  %1797 = vmatprep.mubr.f32.mxu1 %v998_v57  ;;  %v1001_v15 = vmax.f32 %v935_v62, 0.0  ;;  %v1265_v57 = vld [vmem:[%s2678_s3 + $0xa0] sm:$0xff] }
 0x317   :  { %v1749_v0 = vpop.f32.mrf.mxu0  ;;  %1798 = vmatmul.mubr.f32.vlgmr.msra.gmra.mxu1 %v999_v59 }
 0x318   :  { %v1000_v14 = vmax.f32 %v930_v12, 0.0  ;;  %v945_v7 = vadd.f32 %v1749_v0, %v2366_v45  ;;  %v1268_v12 = vld [vmem:[%s2678_s3 + $0xb8] sm:$0xff] }
 0x319   :  { %v939_v17 = vpop.f32.mrf.mxu0 }
 0x31a   :  { %v940_v1 = vadd.f32 %v939_v17, %v2366_v45  ;;  %1800 = vmatprep.mubr.f32.mxu1 %v1000_v14  ;;  %v1003_v33 = vmax.f32 %v945_v7, 0.0  ;;  %v1267_v7 = vld [vmem:[%s2678_s3 + $0xb0] sm:$0xff] }
 0x31b   :  { %v1752_v32 = vpop.f32.mrf.mxu0  ;;  %1801 = vmatmul.mubr.f32.gmra.mxu1 %v1001_v15 }
 0x31c   :  { %v1002_v13 = vmax.f32 %v940_v1, 0.0  ;;  %v955_v36 = vadd.f32 %v1752_v32, %v2366_v45 }
 0x31d   :  { %v949_v2 = vpop.f32.mrf.mxu0 }
 0x31e   :  { %v950_v39 = vadd.f32 %v949_v2, %v2366_v45  ;;  %1803 = vmatprep.mubr.f32.mxu1 %v1002_v13  ;;  %v1005_v51 = vmax.f32 %v955_v36, 0.0  ;;  %v1270_v13 = vld [vmem:[%s2678_s3 + $0xc8] sm:$0xff] }
 0x31f   :  { %v1755_v42 = vpop.f32.mrf.mxu0  ;;  %1804 = vmatmul.mubr.f32.gmra.mxu1 %v1003_v33 }
 0x320   :  { %v1004_v48 = vmax.f32 %v950_v39, 0.0  ;;  %v965_v52 = vadd.f32 %v1755_v42, %v2366_v45  ;;  %v1269_v39 = vld [vmem:[%s2678_s3 + $0xc0] sm:$0xff] }
 0x321   :  { %v959_v53 = vpop.f32.mrf.mxu0 }
 0x322   :  { %v960_v55 = vadd.f32 %v959_v53, %v2366_v45  ;;  %1806 = vmatprep.mubr.f32.mxu1 %v1004_v48  ;;  %v1007_v11 = vmax.f32 %v965_v52, 0.0  ;;  %v1272_v52 = vld [vmem:[%s2678_s3 + $0xd8] sm:$0xff] }
 0x323   :  { %v1758_v56 = vpop.f32.mrf.mxu0  ;;  %1807 = vmatmul.mubr.f32.gmra.mxu1 %v1005_v51 }
 0x324   :  { %v1006_v58 = vmax.f32 %v960_v55, 0.0  ;;  %v975_v4 = vadd.f32 %v1758_v56, %v2366_v45 }
 0x325   :  { %v969_v18 = vpop.f32.mrf.mxu0 }
 0x326   :  { %v970_v10 = vadd.f32 %v969_v18, %v2366_v45  ;;  %1809 = vmatprep.mubr.f32.mxu1 %v1006_v58  ;;  %v1009_v20 = vmax.f32 %v975_v4, 0.0  ;;  %v1271_v58 = vld [vmem:[%s2678_s3 + $0xd0] sm:$0xff] }
 0x327   :  { %v1761_v16 = vpop.f32.mrf.mxu0  ;;  %1810 = vmatmul.mubr.f32.gmra.mxu1 %v1007_v11 }
 0x328   :  { %v1008_v34 = vmax.f32 %v970_v10, 0.0  ;;  %v985_v35 = vadd.f32 %v1761_v16, %v2366_v45  ;;  %v1274_v10 = vld [vmem:[%s2678_s3 + $0xe8] sm:$0xff] }
 0x329   :  { %v979_v19 = vpop.f32.mrf.mxu0 }
 0x32a   :  { %v980_v37 = vadd.f32 %v979_v19, %v2366_v45  ;;  %1812 = vmatprep.mubr.f32.mxu1 %v1008_v34  ;;  %v1011_v22 = vmax.f32 %v985_v35, 0.0  ;;  %v1273_v35 = vld [vmem:[%s2678_s3 + $0xe0] sm:$0xff] }
 0x32b   :  { %v1764_v38 = vpop.f32.mrf.mxu0  ;;  %1813 = vmatmul.mubr.f32.gmra.mxu1 %v1009_v20 }
 0x32c   :  { %v1010_v40 = vmax.f32 %v980_v37, 0.0  ;;  %v995_v41 = vadd.f32 %v1764_v38, %v2366_v45 }
 0x32d   :  { %v989_v21 = vpop.f32.mrf.mxu0 }
 0x32e   :  { %v990_v43 = vadd.f32 %v989_v21, %v2366_v45  ;;  %1815 = vmatprep.mubr.f32.mxu1 %v1010_v40  ;;  %v1013_v46 = vmax.f32 %v995_v41, 0.0  ;;  %v1276_v40 = vld [vmem:[%s2678_s3 + $0xf8] sm:$0xff] }
 0x32f   :  { %1816 = vmatmul.mubr.f32.gmra.mxu1 %v1011_v22 }
 0x330   :  { %v1012_v44 = vmax.f32 %v990_v43, 0.0  ;;  %v1275_v43 = vld [vmem:[%s2678_s3 + $0xf0] sm:$0xff] }
 0x332   :  { %1818 = vmatprep.mubr.f32.mxu1 %v1012_v44 }
 0x333   :  { %1819 = vmatmul.mubr.f32.gmra.mxu1 %v1013_v46 }
 0x3d7   :  { %v1799_v25 = vpop.f32.mrf.mxu1 }
 0x3d8   :  { %v1086_v26 = vadd.f32 %v1799_v25, %v2433_v30 }
 0x3d9   :  { %v1080_v49 = vpop.f32.mrf.mxu1 }
 0x3da   :  { %v1177_v28 = vadd.f32 %v1262_v47, %v1086_v26  ;;  %v1081_v45 = vadd.f32 %v1080_v49, %v2433_v30 }
 0x3db   :  { %v1802_v27 = vpop.f32.mrf.mxu1 }
 0x3dc   :  { %1278 = vst [vmem:[%s2679_s4 + $0x88] sm:$0xff] %v1177_v28  ;;  %v1176_v3 = vadd.f32 %v1261_v50, %v1081_v45  ;;  %v1096_v54 = vadd.f32 %v1802_v27, %v2433_v30 }
 0x3dd   :  { %v1090_v29 = vpop.f32.mrf.mxu1 }
 0x3de   :  { %1277 = vst [vmem:[%s2679_s4 + $0x80] sm:$0xff] %v1176_v3  ;;  %v1179_v5 = vadd.f32 %v1264_v23, %v1096_v54  ;;  %v1091_v6 = vadd.f32 %v1090_v29, %v2433_v30 }
 0x3df   :  { %v1805_v61 = vpop.f32.mrf.mxu1 }
 0x3e0   :  { %1280 = vst [vmem:[%s2679_s4 + $0x98] sm:$0xff] %v1179_v5  ;;  %v1178_v60 = vadd.f32 %v1263_v24, %v1091_v6  ;;  %v1106_v31 = vadd.f32 %v1805_v61, %v2433_v30 }
 0x3e1   :  { %v1100_v9 = vpop.f32.mrf.mxu1 }
 0x3e2   :  { %1279 = vst [vmem:[%s2679_s4 + $0x90] sm:$0xff] %v1178_v60  ;;  %v1181_v59 = vadd.f32 %v1266_v8, %v1106_v31  ;;  %v1101_v62 = vadd.f32 %v1100_v9, %v2433_v30 }
 0x3e3   :  { %v1808_v63 = vpop.f32.mrf.mxu1 }
 0x3e4   :  { %1282 = vst [vmem:[%s2679_s4 + $0xa8] sm:$0xff] %v1181_v59  ;;  %v1180_v0 = vadd.f32 %v1265_v57, %v1101_v62  ;;  %v1116_v14 = vadd.f32 %v1808_v63, %v2433_v30 }
 0x3e5   :  { %v1110_v15 = vpop.f32.mrf.mxu1 }
 0x3e6   :  { %1281 = vst [vmem:[%s2679_s4 + $0xa0] sm:$0xff] %v1180_v0  ;;  %v1183_v17 = vadd.f32 %v1268_v12, %v1116_v14  ;;  %v1111_v1 = vadd.f32 %v1110_v15, %v2433_v30 }
 0x3e7   :  { %v1811_v32 = vpop.f32.mrf.mxu1 }
 0x3e8   :  { %1284 = vst [vmem:[%s2679_s4 + $0xb8] sm:$0xff] %v1183_v17  ;;  %v1182_v33 = vadd.f32 %v1267_v7, %v1111_v1  ;;  %v1126_v36 = vadd.f32 %v1811_v32, %v2433_v30 }
 0x3e9   :  { %v1120_v2 = vpop.f32.mrf.mxu1 }
 0x3ea   :  { %1283 = vst [vmem:[%s2679_s4 + $0xb0] sm:$0xff] %v1182_v33  ;;  %v1185_v42 = vadd.f32 %v1270_v13, %v1126_v36  ;;  %v1121_v48 = vadd.f32 %v1120_v2, %v2433_v30 }
 0x3eb   :  { %v1814_v51 = vpop.f32.mrf.mxu1 }
 0x3ec   :  { %1286 = vst [vmem:[%s2679_s4 + $0xc8] sm:$0xff] %v1185_v42  ;;  %v1184_v53 = vadd.f32 %v1269_v39, %v1121_v48  ;;  %v1136_v55 = vadd.f32 %v1814_v51, %v2433_v30 }
 0x3ed   :  { %v1130_v56 = vpop.f32.mrf.mxu1 }
 0x3ee   :  { %1285 = vst [vmem:[%s2679_s4 + $0xc0] sm:$0xff] %v1184_v53  ;;  %v1187_v11 = vadd.f32 %v1272_v52, %v1136_v55  ;;  %v1131_v4 = vadd.f32 %v1130_v56, %v2433_v30 }
 0x3ef   :  { %v1817_v18 = vpop.f32.mrf.mxu1 }
 0x3f0   :  { %1288 = vst [vmem:[%s2679_s4 + $0xd8] sm:$0xff] %v1187_v11  ;;  %v1186_v16 = vadd.f32 %v1271_v58, %v1131_v4  ;;  %v1146_v34 = vadd.f32 %v1817_v18, %v2433_v30 }
 0x3f1   :  { %v1140_v20 = vpop.f32.mrf.mxu1 }
 0x3f2   :  { %1287 = vst [vmem:[%s2679_s4 + $0xd0] sm:$0xff] %v1186_v16  ;;  %v1189_v19 = vadd.f32 %v1274_v10, %v1146_v34  ;;  %v1141_v37 = vadd.f32 %v1140_v20, %v2433_v30 }
 0x3f3   :  { %v1820_v38 = vpop.f32.mrf.mxu1 }
 0x3f4   :  { %1290 = vst [vmem:[%s2679_s4 + $0xe8] sm:$0xff] %v1189_v19  ;;  %v1188_v22 = vadd.f32 %v1273_v35, %v1141_v37  ;;  %v1156_v41 = vadd.f32 %v1820_v38, %v2433_v30 }
 0x3f5   :  { %v1150_v21 = vpop.f32.mrf.mxu1 }
 0x3f6   :  { %1289 = vst [vmem:[%s2679_s4 + $0xe0] sm:$0xff] %v1188_v22  ;;  %v1191_v44 = vadd.f32 %v1276_v40, %v1156_v41  ;;  %v1151_v46 = vadd.f32 %v1150_v21, %v2433_v30 }
 0x3f8   :  { %1292 = vst [vmem:[%s2679_s4 + $0xf8] sm:$0xff] %v1191_v44  ;;  %v1190_v25 = vadd.f32 %v1275_v43, %v1151_v46 }
 0x3fa   :  { %1291 = vst [vmem:[%s2679_s4 + $0xf0] sm:$0xff] %v1190_v25 }

</bundles_post_ra>
